<compile_context>
chip_gen: v5e
topology: v5e:2x2
jax: 0.10.0
libtpu: 0.0.40
codegen_flags: <defaults>
</compile_context>

<pallas_src>
import jax
import jax.numpy as jnp
import numpy as np
from jax import lax
from jax.experimental import pallas as pl
from jax.experimental.pallas import tpu as pltpu


# ---------------------------------------------------------------------------
# Kernel A: once-per-sequence precompute (supports, E_rep, biases, weights out)
# ---------------------------------------------------------------------------
def _make_precompute_kernel(N, D, K, H, KCp):
    def kernel(e_ref, ball_ref, wuflat_ref,
               sstk_ref, erep_ref, bg_ref, bu_ref, wout_ref):
        E = e_ref[...]                                               # [N, D]

        # --- adaptive adjacency: S = softmax(relu(E @ E^T), axis=1) ---------
        A = lax.dot_general(E, E, (((1,), (1,)), ((), ())),
                            preferred_element_type=jnp.float32)      # [N, N]
        A = jnp.maximum(A, 0.0)
        A = A - jnp.max(A, axis=1, keepdims=True)
        eA = jnp.exp(A)
        den = jnp.sum(eA, axis=1, keepdims=True)
        inv = pl.reciprocal(den, approx=True)        # EUP slot (otherwise idle)
        inv = inv * (2.0 - den * inv)                # one Newton step: ~eps^2
        S = eA * inv

        # --- Chebyshev supports T_1..T_{K-1}; T_0 = I is applied implicitly -
        supports = [S]
        if K > 2:
            row = lax.broadcasted_iota(jnp.int32, (N, N), 0)
            col = lax.broadcasted_iota(jnp.int32, (N, N), 1)
            t_pp = (row == col).astype(jnp.float32)                  # T_0 = I
            t_p = S
            for _ in range(2, K):
                t = (2.0 * jnp.dot(S, t_p, preferred_element_type=jnp.float32)
                     - t_pp)
                supports.append(t)
                t_pp, t_p = t_p, t
        sstk_ref[...] = jnp.concatenate(supports, axis=0)            # [(K-1)N, N]

        # --- hoisted E-column lane broadcast: E_rep[n, d*KCp + j] = E[n, d] --
        erep_ref[...] = jnp.concatenate(
            [jnp.broadcast_to(E[:, d:d + 1], (N, KCp)) for d in range(D)],
            axis=-1)                                                 # [N, D*KCp]

        # --- fused per-node biases: E @ [gate_b | update_b] -----------------
        bias = jnp.dot(E, ball_ref[...],
                       preferred_element_type=jnp.float32)           # [N, 3H]
        bg_ref[...] = bias[:, :2 * H]
        bu_ref[...] = bias[:, 2 * H:]

        # --- per-node update-GCN weights (returned by the torch module) ------
        wout_ref[...] = jnp.dot(E, wuflat_ref[...],
                                preferred_element_type=jnp.float32)

    return kernel


# ---------------------------------------------------------------------------
# Kernel B: per-timestep GRU step, gridded over the batch axis
# ---------------------------------------------------------------------------
def _make_step_kernel(N, C_in, H, D, K, KCp, matmul_dtype):
    C = C_in + H
    KC = K * C
    pad = KCp - KC
    md = matmul_dtype

    def kernel(x_ref, s_ref, sstk_ref, erep_ref, bg_ref, bu_ref,
               wg_ref, wu_ref, h_ref):
        x = x_ref[...]                            # [N, C_in]
        s = s_ref[...]                            # [N, H]
        Sstk = sstk_ref[...].astype(md)           # [(K-1)*N, N]
        Erep = erep_ref[...]                      # [N, D*KCp] (f32)

        zpad = jnp.zeros((N, pad), jnp.float32) if pad else None

        def to_xgE(parts):
            # parts: lane pieces summing to K*C; pad to KCp; tile D times
            # (aligned vreg copies) and scale by the hoisted E_rep broadcast:
            #   xgE[n, d*KCp + k*C + c] = E[n, d] * (T_k @ feat)[n, c]
            xg = jnp.concatenate(parts + ([zpad] if pad else []), axis=-1)
            return (Erep * jnp.concatenate([xg] * D, axis=-1)).astype(md)

        # --- gate pass: one stacked-support matmul + one deep matmul ---------
        feat_g = jnp.concatenate([x, s], axis=-1)                    # [N, C]
        tg = jnp.dot(Sstk, feat_g.astype(md),
                     preferred_element_type=jnp.float32)             # [(K-1)N, C]
        xgE = to_xgE([feat_g] + [tg[k * N:(k + 1) * N] for k in range(K - 1)])
        zr = jax.nn.sigmoid(
            jnp.dot(xgE, wg_ref[...], preferred_element_type=jnp.float32)
            + bg_ref[...])                                           # [N, 2H]
        z = zr[:, :H]
        r = zr[:, H:]

        # --- candidate pass: reuse T_k @ x, only redo T_k @ (z*state) --------
        zs = z * s
        tzs = jnp.dot(Sstk, zs.astype(md),
                      preferred_element_type=jnp.float32)            # [(K-1)N, H]
        cand_parts = [jnp.concatenate([x, zs], axis=-1)]
        for k in range(K - 1):
            cand_parts.append(jnp.concatenate(
                [tg[k * N:(k + 1) * N, :C_in], tzs[k * N:(k + 1) * N]],
                axis=-1))
        xgEu = to_xgE(cand_parts)
        hc = jnp.tanh(
            jnp.dot(xgEu, wu_ref[...], preferred_element_type=jnp.float32)
            + bu_ref[...])                                           # [N, H]

        h_ref[...] = (r * s + (1.0 - r) * hc).astype(h_ref.dtype)

    return kernel


# ---------------------------------------------------------------------------
# Wrapper (parameter re-layout is free XLA reshape/concat glue)
# ---------------------------------------------------------------------------
def agcrn_cell_forward(x, state, node_embeddings, params, cheb_k,
                       matmul_dtype=jnp.float32):
    B, N, C_in = x.shape
    H = state.shape[-1]
    D = node_embeddings.shape[-1]
    C = C_in + H
    K = cheb_k
    assert K >= 2, "cheb_k must be >= 2 (torch AVWGCN always stacks [I, S])"
    KC = K * C
    KCp = -(-KC // 128) * 128            # per-d contraction block, lane aligned
    padc = KCp - KC

    def pool2d(w, O):                    # [D, K, C, O] -> [D*KCp, O]
        w2 = w.reshape(D, KC, O)
        if padc:
            w2 = jnp.concatenate(
                [w2, jnp.zeros((D, padc, O), w2.dtype)], axis=1)
        return w2.reshape(D * KCp, O).astype(matmul_dtype)

    wg = pool2d(params["gate_w"], 2 * H)                  # [D*KCp, 2H]  (z|r fused)
    wu = pool2d(params["update_w"], H)                    # [D*KCp, H]
    b_all = jnp.concatenate([params["gate_b"], params["update_b"]], axis=-1)
    wu_flat = params["update_w"].reshape(D, KC * H)       # for the weights output

    # --- once-per-sequence precompute (hoist out of a scan over time) --------
    pre_kernel = _make_precompute_kernel(N, D, K, H, KCp)
    sstack, e_rep, bias_g, bias_u, w_out = pl.pallas_call(
        pre_kernel,
        out_shape=(jax.ShapeDtypeStruct(((K - 1) * N, N), jnp.float32),
                   jax.ShapeDtypeStruct((N, D * KCp), jnp.float32),
                   jax.ShapeDtypeStruct((N, 2 * H), jnp.float32),
                   jax.ShapeDtypeStruct((N, H), jnp.float32),
                   jax.ShapeDtypeStruct((N, KC * H), jnp.float32)),
        grid_spec=pltpu.PrefetchScalarGridSpec(
            num_scalar_prefetch=0,
            grid=(1,),
            in_specs=[pl.BlockSpec((N, D), lambda i: (0, 0)),
                      pl.BlockSpec((D, 3 * H), lambda i: (0, 0)),
                      pl.BlockSpec((D, KC * H), lambda i: (0, 0))],
            out_specs=[pl.BlockSpec(((K - 1) * N, N), lambda i: (0, 0)),
                       pl.BlockSpec((N, D * KCp), lambda i: (0, 0)),
                       pl.BlockSpec((N, 2 * H), lambda i: (0, 0)),
                       pl.BlockSpec((N, H), lambda i: (0, 0)),
                       pl.BlockSpec((N, KC * H), lambda i: (0, 0))],
        ),
        compiler_params=pltpu.CompilerParams(
            dimension_semantics=("arbitrary",)),
    )(node_embeddings, b_all, wu_flat)

    # --- per-timestep GRU step: grid over batch, parallel across TCs ----------
    step_kernel = _make_step_kernel(N, C_in, H, D, K, KCp, matmul_dtype)
    h = pl.pallas_call(
        step_kernel,
        out_shape=jax.ShapeDtypeStruct((B, N, H), jnp.float32),
        grid_spec=pltpu.PrefetchScalarGridSpec(
            num_scalar_prefetch=0,
            grid=(B,),
            in_specs=[pl.BlockSpec((None, N, C_in), lambda b: (b, 0, 0)),
                      pl.BlockSpec((None, N, H), lambda b: (b, 0, 0)),
                      pl.BlockSpec(((K - 1) * N, N), lambda b: (0, 0)),
                      pl.BlockSpec((N, D * KCp), lambda b: (0, 0)),
                      pl.BlockSpec((N, 2 * H), lambda b: (0, 0)),
                      pl.BlockSpec((N, H), lambda b: (0, 0)),
                      pl.BlockSpec((D * KCp, 2 * H), lambda b: (0, 0)),
                      pl.BlockSpec((D * KCp, H), lambda b: (0, 0))],
            out_specs=pl.BlockSpec((None, N, H), lambda b: (b, 0, 0)),
        ),
        compiler_params=pltpu.CompilerParams(
            dimension_semantics=("parallel",),          # shards batch on v7x
            vmem_limit_bytes=32 * 1024 * 1024),
    )(x, state, sstack, e_rep, bias_g, bias_u, wg, wu)

    return h, w_out.reshape(N, K, C, H)


# ---------------------------------------------------------------------------
# Pure-JAX reference (mirrors the PyTorch AGCRNCell / AVWGCN semantics)
# ---------------------------------------------------------------------------
def _avwgcn_ref(x, E, w_pool, b_pool, cheb_k):
    N = E.shape[0]
    S = jax.nn.softmax(jax.nn.relu(E @ E.T), axis=1)
    support_set = [jnp.eye(N, dtype=x.dtype), S]
    for _ in range(2, cheb_k):
        support_set.append(2.0 * S @ support_set[-1] - support_set[-2])
    supports = jnp.stack(support_set, axis=0)                  # [K, N, N]
    weights = jnp.einsum('nd,dkio->nkio', E, w_pool)           # [N, K, C, O]
    bias = E @ b_pool                                          # [N, O]
    x_g = jnp.einsum('knm,bmc->bknc', supports, x)
    x_g = jnp.transpose(x_g, (0, 2, 1, 3))                     # [B, N, K, C]
    out = jnp.einsum('bnki,nkio->bno', x_g, weights) + bias
    return out, weights


def agcrn_cell_ref(x, state, E, params, cheb_k, H):
    inp = jnp.concatenate([x, state], axis=-1)
    z_r, _ = _avwgcn_ref(inp, E, params["gate_w"], params["gate_b"], cheb_k)
    z_r = jax.nn.sigmoid(z_r)
    z, r = z_r[..., :H], z_r[..., H:]
    cand = jnp.concatenate([x, z * state], axis=-1)
    hc, weights = _avwgcn_ref(cand, E, params["update_w"], params["update_b"],
                              cheb_k)
    hc = jnp.tanh(hc)
    h = r * state + (1.0 - r) * hc
    return h, weights


# ---------------------------------------------------------------------------
if __name__ == "__main__":
    # node_num=16, dim_in=4, dim_out(hidden)=32, cheb_k=3, embed_dim=8, batch=2
    B, N, C_in, H, D, K = 2, 16, 4, 32, 8, 3
    C = C_in + H

    key = jax.random.PRNGKey(0)
    ks = jax.random.split(key, 7)
    x = jax.random.normal(ks[0], (B, N, C_in), jnp.float32)
    state = jax.random.normal(ks[1], (B, N, H), jnp.float32)
    node_embeddings = jax.random.normal(ks[2], (N, D), jnp.float32)
    params = {
        "gate_w": 0.1 * jax.random.normal(ks[3], (D, K, C, 2 * H), jnp.float32),
        "gate_b": 0.1 * jax.random.normal(ks[4], (D, 2 * H), jnp.float32),
        "update_w": 0.1 * jax.random.normal(ks[5], (D, K, C, H), jnp.float32),
        "update_b": 0.1 * jax.random.normal(ks[6], (D, H), jnp.float32),
    }

    h, w = agcrn_cell_forward(x, state, node_embeddings, params, K)
    jax.block_until_ready((h, w))

    h_ref, w_ref = agcrn_cell_ref(x, state, node_embeddings, params, K, H)
    np.testing.assert_allclose(np.asarray(h), np.asarray(h_ref),
                               rtol=2e-3, atol=2e-3)
    np.testing.assert_allclose(np.asarray(w), np.asarray(w_ref),
                               rtol=2e-3, atol=2e-3)
    print("KERNEL_OK")
</pallas_src>

<mosaic_0001>
module attributes {stable_mosaic.version = 11 : i64} {
  func.func @kernel(%arg0: i32, %arg1: memref<16x8xf32, #tpu.memory_space<vmem>>, %arg2: memref<8x96xf32, #tpu.memory_space<vmem>>, %arg3: memref<8x3456xf32, #tpu.memory_space<vmem>>, %arg4: memref<32x16xf32, #tpu.memory_space<vmem>>, %arg5: memref<16x1024xf32, #tpu.memory_space<vmem>>, %arg6: memref<16x64xf32, #tpu.memory_space<vmem>>, %arg7: memref<16x32xf32, #tpu.memory_space<vmem>>, %arg8: memref<16x3456xf32, #tpu.memory_space<vmem>>) attributes {dimension_semantics = [#tpu.dimension_semantics<arbitrary>], iteration_bounds = array<i64: 1>, scalar_prefetch = 0 : i64, scratch_operands = 0 : i64, tpu.core_type = #tpu.core_type<tc>, window_params = [{pipeline_mode = #tpu.pipeline_mode<synchronous>, transform_indices = @transform_0, window_bounds = array<i64: 16, 8>}, {pipeline_mode = #tpu.pipeline_mode<synchronous>, transform_indices = @transform_1, window_bounds = array<i64: 8, 96>}, {pipeline_mode = #tpu.pipeline_mode<synchronous>, transform_indices = @transform_2, window_bounds = array<i64: 8, 3456>}, {pipeline_mode = #tpu.pipeline_mode<synchronous>, transform_indices = @transform_3, window_bounds = array<i64: 32, 16>}, {pipeline_mode = #tpu.pipeline_mode<synchronous>, transform_indices = @transform_4, window_bounds = array<i64: 16, 1024>}, {pipeline_mode = #tpu.pipeline_mode<synchronous>, transform_indices = @transform_5, window_bounds = array<i64: 16, 64>}, {pipeline_mode = #tpu.pipeline_mode<synchronous>, transform_indices = @transform_6, window_bounds = array<i64: 16, 32>}, {pipeline_mode = #tpu.pipeline_mode<synchronous>, transform_indices = @transform_7, window_bounds = array<i64: 16, 3456>}]} {
    %c0 = arith.constant 0 : index
    %c0_0 = arith.constant 0 : index
    %0 = vector.load %arg1[%c0, %c0_0] : memref<16x8xf32, #tpu.memory_space<vmem>>, vector<16x8xf32>
    %cst = arith.constant dense<0.000000e+00> : vector<16x16xf32>
    %1 = tpu.matmul %0, %0, %cst {dimension_numbers = #tpu.dot_dimension_numbers<[1], [1], [0], [0], [0, 0, 1, 0], [], []>} : vector<16x8xf32>, vector<16x8xf32>, vector<16x16xf32> -> vector<16x16xf32>
    %cst_1 = arith.constant 0.000000e+00 : f32
    %2 = vector.broadcast %cst_1 : f32 to vector<16x16xf32>
    %3 = arith.maximumf %1, %2 : vector<16x16xf32>
    %cst_2 = arith.constant dense<0xFF800000> : vector<16xf32>
    %4 = vector.multi_reduction <maximumf>, %3, %cst_2 [1] : vector<16x16xf32> to vector<16xf32>
    %5 = vector.shape_cast %4 : vector<16xf32> to vector<16x1xf32>
    %6 = vector.broadcast %5 : vector<16x1xf32> to vector<16x16xf32>
    %7 = arith.subf %3, %6 : vector<16x16xf32>
    %8 = math.exp %7 : vector<16x16xf32>
    %cst_3 = arith.constant dense<0.000000e+00> : vector<16xf32>
    %9 = vector.multi_reduction <add>, %8, %cst_3 [1] : vector<16x16xf32> to vector<16xf32>
    %10 = vector.shape_cast %9 : vector<16xf32> to vector<16x1xf32>
    %11 = tpu.reciprocal %10 {approx = true} : vector<16x1xf32> -> vector<16x1xf32>
    %12 = arith.mulf %10, %11 : vector<16x1xf32>
    %cst_4 = arith.constant 2.000000e+00 : f32
    %13 = vector.broadcast %cst_4 : f32 to vector<16x1xf32>
    %14 = arith.subf %13, %12 : vector<16x1xf32>
    %15 = arith.mulf %11, %14 : vector<16x1xf32>
    %16 = vector.broadcast %15 : vector<16x1xf32> to vector<16x16xf32>
    %17 = arith.mulf %8, %16 : vector<16x16xf32>
    %18 = tpu.iota {dimensions = array<i32: 0>} : vector<16x16xi32>
    %19 = tpu.iota {dimensions = array<i32: 1>} : vector<16x16xi32>
    %20 = arith.cmpi eq, %18, %19 : vector<16x16xi32>
    %21 = arith.extui %20 : vector<16x16xi1> to vector<16x16xi32>
    %22 = arith.sitofp %21 : vector<16x16xi32> to vector<16x16xf32>
    %cst_5 = arith.constant dense<0.000000e+00> : vector<16x16xf32>
    %23 = tpu.matmul %17, %17, %cst_5 {dimension_numbers = #tpu.dot_dimension_numbers<[1], [0], [0], [1], [0, 0, 1, 1], [], []>} : vector<16x16xf32>, vector<16x16xf32>, vector<16x16xf32> -> vector<16x16xf32>
    %cst_6 = arith.constant 2.000000e+00 : f32
    %24 = vector.broadcast %cst_6 : f32 to vector<16x16xf32>
    %25 = arith.mulf %24, %23 : vector<16x16xf32>
    %26 = arith.subf %25, %22 : vector<16x16xf32>
    %27 = tpu.concatenate %17, %26 in 0 : vector<16x16xf32>, vector<16x16xf32> -> vector<32x16xf32>
    %c0_7 = arith.constant 0 : index
    %c0_8 = arith.constant 0 : index
    %28 = vector.load %arg4[%c0_7, %c0_8] : memref<32x16xf32, #tpu.memory_space<vmem>>, vector<32x16xf32>
    tpu.vector_store %arg4[%c0_7, %c0_8], %27 {strides = array<i32>} : memref<32x16xf32, #tpu.memory_space<vmem>>, vector<32x16xf32>,
    %29 = vector.extract_strided_slice %0 {offsets = [0, 0], sizes = [16, 1], strides = [1, 1]} : vector<16x8xf32> to vector<16x1xf32>
    %30 = vector.shape_cast %29 : vector<16x1xf32> to vector<16x1xf32>
    %31 = vector.broadcast %30 : vector<16x1xf32> to vector<16x128xf32>
    %32 = vector.extract_strided_slice %0 {offsets = [0, 1], sizes = [16, 1], strides = [1, 1]} : vector<16x8xf32> to vector<16x1xf32>
    %33 = vector.shape_cast %32 : vector<16x1xf32> to vector<16x1xf32>
    %34 = vector.broadcast %33 : vector<16x1xf32> to vector<16x128xf32>
    %35 = vector.extract_strided_slice %0 {offsets = [0, 2], sizes = [16, 1], strides = [1, 1]} : vector<16x8xf32> to vector<16x1xf32>
    %36 = vector.shape_cast %35 : vector<16x1xf32> to vector<16x1xf32>
    %37 = vector.broadcast %36 : vector<16x1xf32> to vector<16x128xf32>
    %38 = vector.extract_strided_slice %0 {offsets = [0, 3], sizes = [16, 1], strides = [1, 1]} : vector<16x8xf32> to vector<16x1xf32>
    %39 = vector.shape_cast %38 : vector<16x1xf32> to vector<16x1xf32>
    %40 = vector.broadcast %39 : vector<16x1xf32> to vector<16x128xf32>
    %41 = vector.extract_strided_slice %0 {offsets = [0, 4], sizes = [16, 1], strides = [1, 1]} : vector<16x8xf32> to vector<16x1xf32>
    %42 = vector.shape_cast %41 : vector<16x1xf32> to vector<16x1xf32>
    %43 = vector.broadcast %42 : vector<16x1xf32> to vector<16x128xf32>
    %44 = vector.extract_strided_slice %0 {offsets = [0, 5], sizes = [16, 1], strides = [1, 1]} : vector<16x8xf32> to vector<16x1xf32>
    %45 = vector.shape_cast %44 : vector<16x1xf32> to vector<16x1xf32>
    %46 = vector.broadcast %45 : vector<16x1xf32> to vector<16x128xf32>
    %47 = vector.extract_strided_slice %0 {offsets = [0, 6], sizes = [16, 1], strides = [1, 1]} : vector<16x8xf32> to vector<16x1xf32>
    %48 = vector.shape_cast %47 : vector<16x1xf32> to vector<16x1xf32>
    %49 = vector.broadcast %48 : vector<16x1xf32> to vector<16x128xf32>
    %50 = vector.extract_strided_slice %0 {offsets = [0, 7], sizes = [16, 1], strides = [1, 1]} : vector<16x8xf32> to vector<16x1xf32>
    %51 = vector.shape_cast %50 : vector<16x1xf32> to vector<16x1xf32>
    %52 = vector.broadcast %51 : vector<16x1xf32> to vector<16x128xf32>
    %53 = tpu.concatenate %31, %34, %37, %40, %43, %46, %49, %52 in 1 : vector<16x128xf32>, vector<16x128xf32>, vector<16x128xf32>, vector<16x128xf32>, vector<16x128xf32>, vector<16x128xf32>, vector<16x128xf32>, vector<16x128xf32> -> vector<16x1024xf32>
    %c0_9 = arith.constant 0 : index
    %c0_10 = arith.constant 0 : index
    %54 = vector.load %arg5[%c0_9, %c0_10] : memref<16x1024xf32, #tpu.memory_space<vmem>>, vector<16x1024xf32>
    tpu.vector_store %arg5[%c0_9, %c0_10], %53 {strides = array<i32>} : memref<16x1024xf32, #tpu.memory_space<vmem>>, vector<16x1024xf32>,
    %c0_11 = arith.constant 0 : index
    %c0_12 = arith.constant 0 : index
    %55 = vector.load %arg2[%c0_11, %c0_12] : memref<8x96xf32, #tpu.memory_space<vmem>>, vector<8x96xf32>
    %cst_13 = arith.constant dense<0.000000e+00> : vector<16x96xf32>
    %56 = tpu.matmul %0, %55, %cst_13 {dimension_numbers = #tpu.dot_dimension_numbers<[1], [0], [0], [1], [0, 0, 1, 1], [], []>} : vector<16x8xf32>, vector<8x96xf32>, vector<16x96xf32> -> vector<16x96xf32>
    %57 = vector.extract_strided_slice %56 {offsets = [0, 0], sizes = [16, 64], strides = [1, 1]} : vector<16x96xf32> to vector<16x64xf32>
    %c0_14 = arith.constant 0 : index
    %c0_15 = arith.constant 0 : index
    %58 = vector.load %arg6[%c0_14, %c0_15] : memref<16x64xf32, #tpu.memory_space<vmem>>, vector<16x64xf32>
    tpu.vector_store %arg6[%c0_14, %c0_15], %57 {strides = array<i32>} : memref<16x64xf32, #tpu.memory_space<vmem>>, vector<16x64xf32>,
    %59 = vector.extract_strided_slice %56 {offsets = [0, 64], sizes = [16, 32], strides = [1, 1]} : vector<16x96xf32> to vector<16x32xf32>
    %c0_16 = arith.constant 0 : index
    %c0_17 = arith.constant 0 : index
    %60 = vector.load %arg7[%c0_16, %c0_17] : memref<16x32xf32, #tpu.memory_space<vmem>>, vector<16x32xf32>
    tpu.vector_store %arg7[%c0_16, %c0_17], %59 {strides = array<i32>} : memref<16x32xf32, #tpu.memory_space<vmem>>, vector<16x32xf32>,
    %c0_18 = arith.constant 0 : index
    %c0_19 = arith.constant 0 : index
    %61 = vector.load %arg3[%c0_18, %c0_19] : memref<8x3456xf32, #tpu.memory_space<vmem>>, vector<8x3456xf32>
    %cst_20 = arith.constant dense<0.000000e+00> : vector<16x3456xf32>
    %62 = tpu.matmul %0, %61, %cst_20 {dimension_numbers = #tpu.dot_dimension_numbers<[1], [0], [0], [1], [0, 0, 1, 1], [], []>} : vector<16x8xf32>, vector<8x3456xf32>, vector<16x3456xf32> -> vector<16x3456xf32>
    %c0_21 = arith.constant 0 : index
    %c0_22 = arith.constant 0 : index
    %63 = vector.load %arg8[%c0_21, %c0_22] : memref<16x3456xf32, #tpu.memory_space<vmem>>, vector<16x3456xf32>
    tpu.vector_store %arg8[%c0_21, %c0_22], %62 {strides = array<i32>} : memref<16x3456xf32, #tpu.memory_space<vmem>>, vector<16x3456xf32>,
    return
  }
  func.func @transform_0(%arg0: i32) -> (i32, i32) {
    %c0_i32 = arith.constant 0 : i32
    %c0_i32_0 = arith.constant 0 : i32
    %c0_i32_1 = arith.constant 0 : i32
    return %c0_i32, %c0_i32_0 : i32, i32
  }
  func.func @transform_1(%arg0: i32) -> (i32, i32) {
    %c0_i32 = arith.constant 0 : i32
    %c0_i32_0 = arith.constant 0 : i32
    %c0_i32_1 = arith.constant 0 : i32
    return %c0_i32, %c0_i32_0 : i32, i32
  }
  func.func @transform_2(%arg0: i32) -> (i32, i32) {
    %c0_i32 = arith.constant 0 : i32
    %c0_i32_0 = arith.constant 0 : i32
    %c0_i32_1 = arith.constant 0 : i32
    return %c0_i32, %c0_i32_0 : i32, i32
  }
  func.func @transform_3(%arg0: i32) -> (i32, i32) {
    %c0_i32 = arith.constant 0 : i32
    %c0_i32_0 = arith.constant 0 : i32
    %c0_i32_1 = arith.constant 0 : i32
    return %c0_i32, %c0_i32_0 : i32, i32
  }
  func.func @transform_4(%arg0: i32) -> (i32, i32) {
    %c0_i32 = arith.constant 0 : i32
    %c0_i32_0 = arith.constant 0 : i32
    %c0_i32_1 = arith.constant 0 : i32
    return %c0_i32, %c0_i32_0 : i32, i32
  }
  func.func @transform_5(%arg0: i32) -> (i32, i32) {
    %c0_i32 = arith.constant 0 : i32
    %c0_i32_0 = arith.constant 0 : i32
    %c0_i32_1 = arith.constant 0 : i32
    return %c0_i32, %c0_i32_0 : i32, i32
  }
  func.func @transform_6(%arg0: i32) -> (i32, i32) {
    %c0_i32 = arith.constant 0 : i32
    %c0_i32_0 = arith.constant 0 : i32
    %c0_i32_1 = arith.constant 0 : i32
    return %c0_i32, %c0_i32_0 : i32, i32
  }
  func.func @transform_7(%arg0: i32) -> (i32, i32) {
    %c0_i32 = arith.constant 0 : i32
    %c0_i32_0 = arith.constant 0 : i32
    %c0_i32_1 = arith.constant 0 : i32
    return %c0_i32, %c0_i32_0 : i32, i32
  }
}

</mosaic_0001>

<bundles_post_ra>
// kernel: tpu_custom_call.1
= control target key start
LH: loop header
LB: loop body
LE: loop exit
PB: predicated region body
PF: predicated region fallthrough
CT: control target
= control target key end

     0   :  { %13 = vsyncpa [#allocation3], 0  ;;  %s1538_s0 = inlined_call_operand.vmem [shape: f32[16,8], index: 0, kind: input, shape index: {}]   ;;  %s1539_s1 = inlined_call_operand.vmem [shape: f32[8,96], index: 1, kind: input, shape index: {}]   ;;  %s1540_s2 = inlined_call_operand.hbm [shape: f32[8,3456], index: 2, kind: input, shape index: {}]   ;;  %s1541_s3 = inlined_call_operand.vmem [shape: f32[32,16], index: 3, kind: output, shape index: {0}]   ;;  %s1542_s4 = inlined_call_operand.hbm [shape: f32[16,1024], index: 4, kind: output, shape index: {1}]   ;;  %s1543_s5 = inlined_call_operand.hbm [shape: f32[16,64], index: 5, kind: output, shape index: {2}]   ;;  %s1544_s6 = inlined_call_operand.hbm [shape: f32[16,32], index: 6, kind: output, shape index: {3}]   ;;  %s1545_s7 = inlined_call_operand.hbm [shape: f32[16,3456], index: 7, kind: output, shape index: {4}]  }
   0x1   :  { %14 = vsyncpa [#allocation4], 0 }
   0x2   :  { %15 = vsyncpa [#allocation7], 0 }
   0x3   :  { %16 = vsyncpa [#allocation10], 0  ;;  %s26_s26 = sshll.u32 %s1540_s2, 4  ;;  %s1279_s27 = smov [#allocation2]   ;;  %s27_s26 = int_to_ptr.hbm [resolvable:$true] %s26_s26 }
   0x4   :  { %s28_s28 = sshll.u32 %s1279_s27, 4  ;;  %s29_s28 = int_to_ptr.vmem [resolvable:$true] %s28_s28 }
   0x5   :  { %31 = dma.hbm_to_vmem [thread:$0]  %s27_s26, 3456, %s29_s28, [#allocation3]  }
   0x6   :  { %1271 = dma.done.wait [#allocation3], 3456  }
   0x7   :  { %1272 = vsyncadd [#allocation3], 4294963840  ;;  %vm38_vm0 = vcmask 64512   ;;  %v1345_v0 = vld [vmem:[%s1538_s0 + $0x8] sm:$0xff]  ;;  %v1352_v1 = vld [vmem:[%s1538_s0] sm:$0xff]  ;;  %vm70_vm1 = vcmask 130048  }
   0x8   :  { %1043 = vmatpush.xpose.msk.msra.mxu0 %vm38_vm0, %v1345_v0  ;;  %v227_v18 = vld [vmem:[%s1539_s1] sm:$0xff]  ;;  %v266_v21 = vld [vmem:[#allocation2 + $0x8] sm:$0xff]  ;;  %v267_v22 = vld [vmem:[#allocation2 + $0x10] sm:$0xff]  ;;  %v1280_v44 = vmov 0   ;;  %v1281_v52 = vmov 2   ;;  %v1282_v57 = vmov 1  }
   0x9   :  { %1107 = vmatpush.msra.mxu2 %v227_v18  ;;  %v265_v20 = vld [vmem:[#allocation2] sm:$0xff]  ;;  %v270_v26 = vld [vmem:[#allocation2 + $0x28] sm:$0xff]  ;;  %v271_v27 = vld [vmem:[#allocation2 + $0x30] sm:$0xff]  ;;  %1129 = vset.pattern.permute.xlu2 %v1280_v44  ;;  %v1283_v58 = vmov 3   ;;  %v1284_v61 = vmov 4   ;;  %v1285_v62 = vmov 5  }
   0xa   :  { %1052 = vmatmul.msk.f32.vlgmr.msra.gmra.mxu2 %vm38_vm0, %v1345_v0  ;;  %1108 = vmatpush.msra.mxu3 %v265_v20  ;;  %v269_v29 = vld [vmem:[#allocation2 + $0x20] sm:$0xff]  ;;  %v274_v30 = vld [vmem:[#allocation2 + $0x48] sm:$0xff]  ;;  %v275_v31 = vld [vmem:[#allocation2 + $0x50] sm:$0xff]  ;;  %vm251_vm2 = vcmask 523264   ;;  %s1288_s13 = smov 64   ;;  %s1290_s16 = smov [#allocation6]  }
   0xb   :  { %330 = vmatpush.msrb.mxu2 %v266_v21  ;;  %1054 = vmatmul.msk.f32.vlgmr.msra.gmra.mxu3 %vm38_vm0, %v1345_v0  ;;  %v273_v36 = vld [vmem:[#allocation2 + $0x40] sm:$0xff]  ;;  %v268_v40 = vld [vmem:[#allocation2 + $0x18] sm:$0xff]  ;;  %v278_v41 = vld [vmem:[#allocation2 + $0x68] sm:$0xff]  ;;  %s986_s17 = sshll.u32 %s1290_s16, 4  ;;  %s988_s20 = sshll.u32 %s1543_s5, 4  ;;  %vm262_vm5 = vcmask 261120   ;;  %s987_s17 = int_to_ptr.vmem [resolvable:$true] %s986_s17  ;;  %s989_s20 = int_to_ptr.hbm [resolvable:$true] %s988_s20 }
   0xc   :  { %1044 = vmatpush.xpose.msk.msra.mxu0 %vm38_vm0, %v1352_v1  ;;  %353 = vmatpush.msrb.mxu3 %v267_v22  ;;  %v279_v42 = vld [vmem:[#allocation2 + $0x70] sm:$0xff]  ;;  %v277_v43 = vld [vmem:[#allocation2 + $0x60] sm:$0xff]  ;;  %v272_v45 = vld [vmem:[#allocation2 + $0x38] sm:$0xff]  ;;  %s1291_s5 = smov 128   ;;  %s1292_s23 = smov 8  }
   0xd   :  { %422 = vmatpush.msra.mxu2 %v270_v26  ;;  %148 = vperm.xlu2 %1129, %v1352_v1   ;;  %v282_v46 = vld [vmem:[#allocation2 + $0x88] sm:$0xff]  ;;  %v283_v47 = vld [vmem:[#allocation2 + $0x90] sm:$0xff]  ;;  %v276_v48 = vld [vmem:[#allocation2 + $0x58] sm:$0xff]  ;;  %s975_s25 = sshll.u32 %s1542_s4, 4  ;;  %s1293_s26 = smov [#allocation5]   ;;  %s976_s25 = int_to_ptr.hbm [resolvable:$true] %s975_s25 }
   0xe   :  { %445 = vmatpush.msra.mxu3 %v271_v27  ;;  %v281_v49 = vld [vmem:[#allocation2 + $0x80] sm:$0xff]  ;;  %v286_v50 = vld [vmem:[#allocation2 + $0xa8] sm:$0xff]  ;;  %v287_v51 = vld [vmem:[#allocation2 + $0xb0] sm:$0xff]  ;;  %1131 = vset.pattern.permute.xlu1 %v1282_v57  ;;  %s973_s27 = sshll.u32 %s1293_s26, 4  ;;  %s1294_s28 = smov 1024   ;;  %s974_s27 = int_to_ptr.vmem [resolvable:$true] %s973_s27 }
   0xf   :  { %1045 = vmatmul.msk.f32.vlgmr.msra.gmra.mxu0 %vm38_vm0, %v1352_v1  ;;  %v280_v53 = vld [vmem:[#allocation2 + $0x78] sm:$0xff]  ;;  %v285_v54 = vld [vmem:[#allocation2 + $0xa0] sm:$0xff]  ;;  %v290_v55 = vld [vmem:[#allocation2 + $0xc8] sm:$0xff]  ;;  %1130 = vset.pattern.permute.xlu0 %v1282_v57  ;;  %s1295_s29 = smov [#allocation9]   ;;  %s1014_s9 = sshll.u32 %s1545_s7, 4  ;;  %s1015_s9 = int_to_ptr.hbm [resolvable:$true] %s1014_s9 }
  0x10   :  { %307 = vmatpush.msrb.mxu0 %v265_v20  ;;  %v291_v56 = vld [vmem:[#allocation2 + $0xd0] sm:$0xff]  ;;  %v284_v59 = vld [vmem:[#allocation2 + $0x98] sm:$0xff]  ;;  %v289_v60 = vld [vmem:[#allocation2 + $0xc0] sm:$0xff]  ;;  %s1012_s4 = sshll.u32 %s1295_s29, 4  ;;  %s1296_s0 = smov 3456   ;;  %s1013_s4 = int_to_ptr.vmem [resolvable:$true] %s1012_s4 }
  0x11   :  { %v288_v63 = vld [vmem:[#allocation2 + $0xb8] sm:$0xff]  ;;  %s1297_s2 = smov 216   ;;  %s1298_s1 = smov [#allocation8]  }
  0x12   :  { %1055 = vmatmul.msk.f32.vlgmr.msrb.gmra.mxu2 %vm38_vm0, %v1352_v1  ;;  %399 = vmatpush.msra.mxu0 %v269_v29  ;;  %s999_s10 = sshll.u32 %s1298_s1, 4  ;;  %s1000_s10 = int_to_ptr.vmem [resolvable:$true] %s999_s10 }
  0x13   :  { %1057 = vmatmul.msk.f32.vlgmr.msrb.gmra.mxu3 %vm38_vm0, %v1352_v1  ;;  %514 = vmatpush.msrb.mxu2 %v274_v30 }
  0x14   :  { %537 = vmatpush.msrb.mxu3 %v275_v31 }
  0x15   :  { %152 = vperm.xlu2 %1129, %v1345_v0  }
  0x17   :  { %1046 = vmatmul.msk.f32.gmra.mxu0 %vm38_vm0, %v1345_v0 }
  0x1a   :  { %1056 = vmatmul.msk.f32.gmra.mxu2 %vm38_vm0, %v1345_v0 }
  0x1b   :  { %1058 = vmatmul.msk.f32.gmra.mxu3 %vm38_vm0, %v1345_v0 }
  0x1d   :  { %1132 = vset.pattern.permute.xlu2 %v1281_v52 }
  0x1e   :  { %164 = vperm.xlu2 %1132, %v1352_v1  }
  0x1f   :  { %1053 = vmatmul.msk.f32.vlgmr.msrb.gmra.mxu0 %vm38_vm0, %v1352_v1 }
  0x20   :  { %491 = vmatpush.msrb.mxu0 %v273_v36 }
  0x22   :  { %1063 = vmatmul.msk.f32.vlgmr.msra.gmra.mxu2 %vm38_vm0, %v1352_v1 }
  0x23   :  { %606 = vmatpush.msra.mxu2 %v278_v41  ;;  %1065 = vmatmul.msk.f32.vlgmr.msra.gmra.mxu3 %vm38_vm0, %v1352_v1 }
  0x24   :  { %629 = vmatpush.msra.mxu3 %v279_v42 }
  0x26   :  { %168 = vperm.xlu2 %1132, %v1345_v0  }
  0x27   :  { %1061 = vmatmul.msk.f32.vlgmr.msra.gmra.mxu0 %vm38_vm0, %v1352_v1 }
  0x28   :  { %583 = vmatpush.msra.mxu0 %v277_v43 }
  0x2a   :  { %1064 = vmatmul.msk.f32.gmra.mxu2 %vm38_vm0, %v1345_v0 }
  0x2b   :  { %1066 = vmatmul.msk.f32.gmra.mxu3 %vm38_vm0, %v1345_v0 }
  0x2e   :  { %1133 = vset.pattern.permute.xlu2 %v1283_v58 }
  0x2f   :  { %1062 = vmatmul.msk.f32.gmra.mxu0 %vm38_vm0, %v1345_v0  ;;  %172 = vperm.xlu2 %1133, %v1352_v1  }
  0x32   :  { %1071 = vmatmul.msk.f32.vlgmr.msrb.gmra.mxu2 %vm38_vm0, %v1352_v1 }
  0x33   :  { %698 = vmatpush.msrb.mxu2 %v282_v46  ;;  %1073 = vmatmul.msk.f32.vlgmr.msrb.gmra.mxu3 %vm38_vm0, %v1352_v1 }
  0x34   :  { %721 = vmatpush.msrb.mxu3 %v283_v47 }
  0x37   :  { %1069 = vmatmul.msk.f32.vlgmr.msrb.gmra.mxu0 %vm38_vm0, %v1352_v1  ;;  %176 = vperm.xlu2 %1133, %v1345_v0  }
  0x38   :  { %675 = vmatpush.msrb.mxu0 %v281_v49 }
  0x3a   :  { %1072 = vmatmul.msk.f32.gmra.mxu2 %vm38_vm0, %v1345_v0 }
  0x3b   :  { %1074 = vmatmul.msk.f32.gmra.mxu3 %vm38_vm0, %v1345_v0 }
  0x3f   :  { %1070 = vmatmul.msk.f32.gmra.mxu0 %vm38_vm0, %v1345_v0  ;;  %1135 = vset.pattern.permute.xlu2 %v1284_v61 }
  0x40   :  { %184 = vperm.xlu2 %1135, %v1345_v0  }
  0x42   :  { %1079 = vmatmul.msk.f32.vlgmr.msra.gmra.mxu2 %vm38_vm0, %v1352_v1 }
  0x43   :  { %790 = vmatpush.msra.mxu2 %v286_v50  ;;  %1081 = vmatmul.msk.f32.vlgmr.msra.gmra.mxu3 %vm38_vm0, %v1352_v1 }
  0x44   :  { %813 = vmatpush.msra.mxu3 %v287_v51 }
  0x47   :  { %1077 = vmatmul.msk.f32.vlgmr.msra.gmra.mxu0 %vm38_vm0, %v1352_v1 }
  0x48   :  { %767 = vmatpush.msra.mxu0 %v285_v54 }
  0x4a   :  { %1080 = vmatmul.msk.f32.gmra.mxu2 %vm38_vm0, %v1345_v0 }
  0x4b   :  { %1082 = vmatmul.msk.f32.gmra.mxu3 %vm38_vm0, %v1345_v0 }
  0x4f   :  { %1078 = vmatmul.msk.f32.gmra.mxu0 %vm38_vm0, %v1345_v0 }
  0x52   :  { %1087 = vmatmul.msk.f32.vlgmr.msrb.gmra.mxu2 %vm38_vm0, %v1352_v1 }
  0x53   :  { %882 = vmatpush.msrb.mxu2 %v290_v55  ;;  %1089 = vmatmul.msk.f32.vlgmr.msrb.gmra.mxu3 %vm38_vm0, %v1352_v1 }
  0x54   :  { %905 = vmatpush.msrb.mxu3 %v291_v56 }
  0x57   :  { %1085 = vmatmul.msk.f32.vlgmr.msrb.gmra.mxu0 %vm38_vm0, %v1352_v1 }
  0x58   :  { %859 = vmatpush.msrb.mxu0 %v289_v60 }
  0x5a   :  { %1088 = vmatmul.msk.f32.gmra.mxu2 %vm38_vm0, %v1345_v0 }
  0x5b   :  { %1090 = vmatmul.msk.f32.gmra.mxu3 %vm38_vm0, %v1345_v0 }
  0x5f   :  { %1086 = vmatmul.msk.f32.gmra.mxu0 %vm38_vm0, %v1345_v0 }
  0x62   :  { %1095 = vmatmul.msk.f32.vlgmr.msra.gmra.mxu2 %vm38_vm0, %v1352_v1 }
  0x63   :  { %1097 = vmatmul.msk.f32.vlgmr.msra.gmra.mxu3 %vm38_vm0, %v1352_v1 }
  0x67   :  { %1093 = vmatmul.msk.f32.vlgmr.msra.gmra.mxu0 %vm38_vm0, %v1352_v1 }
  0x6a   :  { %1096 = vmatmul.msk.f32.gmra.mxu2 %vm38_vm0, %v1345_v0 }
  0x6b   :  { %1098 = vmatmul.msk.f32.gmra.mxu3 %vm38_vm0, %v1345_v0 }
  0x6f   :  { %1094 = vmatmul.msk.f32.gmra.mxu0 %vm38_vm0, %v1345_v0 }
  0x72   :  { %1103 = vmatmul.msk.f32.vlgmr.msrb.gmra.mxu2 %vm38_vm0, %v1352_v1 }
  0x73   :  { %1105 = vmatmul.msk.f32.vlgmr.msrb.gmra.mxu3 %vm38_vm0, %v1352_v1 }
  0x77   :  { %1101 = vmatmul.msk.f32.vlgmr.msrb.gmra.mxu0 %vm38_vm0, %v1352_v1 }
  0x7a   :  { %1104 = vmatmul.msk.f32.gmra.mxu2 %vm38_vm0, %v1345_v0 }
  0x7b   :  { %1106 = vmatmul.msk.f32.gmra.mxu3 %vm38_vm0, %v1345_v0 }
  0x7f   :  { %1102 = vmatmul.msk.f32.gmra.mxu0 %vm38_vm0, %v1345_v0 }
  0x8c   :  { %v62_v2 = vpop.f32.mrf.mxu0 }
  0x8d   :  { %v68_v6 = vmax.f32 %v62_v2, 0.0  ;;  %v1286_v2 = vmov 6  }
  0x8e   :  { %1138 = vset.pattern.permute.xlu2 %v1286_v2 }
  0x8f   :  { %v71_v7 = vsel %vm70_vm1, %v68_v6, -inf  ;;  %196 = vperm.xlu2 %1138, %v1352_v1  }
  0x94   :  { %v65_v3 = vpop.f32.mrf.mxu0 }
  0x95   :  { %v69_v4 = vmax.f32 %v65_v3, 0.0  ;;  %v1287_v3 = vmov 7  }
  0x97   :  { %v74_v5 = vsel %vm70_vm1, %v69_v4, -inf  ;;  %1140 = vset.pattern.permute.xlu2 %v1287_v3 }
  0x98   :  { %75 = vmax.xlane.f32.xlu0 %v74_v5  ;;  %204 = vperm.xlu2 %1140, %v1352_v1   ;;  %v312_v5 = vpop.f32.mrf.mxu3 }
  0x99   :  { %940 = vst [vmem:[#allocation9 + $0xd8] sm:$0xff] %v312_v5 }
  0xa0   :  { %72 = vmax.xlane.f32.xlu0 %v71_v7  ;;  %v149_v7 = vpop.permute.xlu2 %148 }
  0xa1   :  { %211 = vst [vmem:[#allocation5] sm:$0xff] %v149_v7 }
  0xb4   :  { %156 = vperm.xlu0 %1130, %v1352_v1  }
  0xbc   :  { %1137 = vset.pattern.permute.xlu0 %v1285_v62 }
  0xbd   :  { %192 = vperm.xlu0 %1137, %v1345_v0  }
  0xc5   :  { %1142 = vset.pattern.permute.xlu0 %v1287_v3 }
 0x10b   :  { %v76_v8 = vpop.xlane.xlu0 %75 }
 0x10c   :  { %v78_v9 = vsub.f32 %v69_v4, %v76_v8  ;;  %v248_v4 = vpop.f32.mrf.mxu2 }
 0x10d   :  { %253 = vst.msk [vmem:[#allocation6 + $0x8] sm:$0xff] %vm251_vm2, %v248_v4  ;;  %258 = vrot.lane.b32.xlu2 %v248_v4, %s1288_s13 }
 0x10e   :  { %v81_v10 = vmul.f32 1.442695, %v78_v9 }
 0x110   :  { %1143 = vpow2.f32 %v81_v10 }
 0x113   :  { %v73_v11 = vpop.xlane.xlu0 %72 }
 0x114   :  { %v77_v12 = vsub.f32 %v68_v6, %v73_v11  ;;  %v309_v6 = vpop.f32.mrf.mxu0  ;;  %v332_v10 = vpop.f32.mrf.mxu2 }
 0x115   :  { %913 = vst [vmem:[#allocation9] sm:$0xff] %v309_v6  ;;  %v355_v11 = vpop.f32.mrf.mxu3 }
 0x116   :  { %v1144_v13 = vpop.eup %1143  ;;  %v79_v14 = vmul.f32 1.442695, %v77_v12  ;;  %914 = vst [vmem:[#allocation9 + $0x8] sm:$0xff] %v332_v10 }
 0x117   :  { %v86_v15 = vsel %vm70_vm1, %v1144_v13, 0.0  ;;  %915 = vst [vmem:[#allocation9 + $0x10] sm:$0xff] %v355_v11 }
 0x118   :  { %1145 = vpow2.f32 %v79_v14  ;;  %87 = vadd.xlane.f32.xlu1 %v86_v15  ;;  %v1289_v14 = vmov 0.0  }
 0x11c   :  { %v401_v12 = vpop.f32.mrf.mxu0 }
 0x11d   :  { %917 = vst [vmem:[#allocation9 + $0x20] sm:$0xff] %v401_v12 }
 0x11e   :  { %v1146_v16 = vpop.eup %1145 }
 0x11f   :  { %v83_v17 = vsel %vm70_vm1, %v1146_v16, 0.0 }
 0x120   :  { %84 = vadd.xlane.f32.xlu1 %v83_v17 }
 0x124   :  { %v404_v20 = vpop.f32.mrf.mxu0 }
 0x125   :  { %944 = vst [vmem:[#allocation9 + $0xf8] sm:$0xff] %v404_v20 }
 0x139   :  { %160 = vperm.xlu1 %1131, %v1345_v0  }
 0x141   :  { %1134 = vset.pattern.permute.xlu1 %v1284_v61  ;;  %v157_v61 = vpop.permute.xlu0 %156 }
 0x142   :  { %180 = vperm.xlu1 %1134, %v1352_v1   ;;  %212 = vst [vmem:[#allocation5 + $0x8] sm:$0xff] %v157_v61 }
 0x14a   :  { %1136 = vset.pattern.permute.xlu1 %v1285_v62 }
 0x14b   :  { %188 = vperm.xlu1 %1136, %v1352_v1  }
 0x153   :  { %1139 = vset.pattern.permute.xlu1 %v1286_v2 }
 0x154   :  { %200 = vperm.xlu1 %1139, %v1345_v0  }
 0x15c   :  { %1141 = vset.pattern.permute.xlu1 %v1287_v3 }
 0x15d   :  { %208 = vperm.xlu1 %1141, %v1345_v0  }
 0x18b   :  { %v88_v19 = vpop.xlane.xlu1 %87 }
 0x18c   :  { %1147 = vrcp.f32 %v88_v19 }
 0x192   :  { %v1148_v23 = vpop.eup %1147 }
 0x193   :  { %v92_v24 = vmul.f32 %v1148_v23, %v88_v19  ;;  %v85_v25 = vpop.xlane.xlu1 %84  ;;  %v358_v19 = vpop.f32.mrf.mxu3 }
 0x194   :  { %1149 = vrcp.f32 %v85_v25  ;;  %942 = vst [vmem:[#allocation9 + $0xe8] sm:$0xff] %v358_v19 }
 0x195   :  { %v94_v28 = vsub.f32 2.0, %v92_v24 }
 0x197   :  { %v96_v32 = vmul.f32 %v1148_v23, %v94_v28  ;;  %v493_v28 = vpop.f32.mrf.mxu0 }
 0x198   :  { %921 = vst [vmem:[#allocation9 + $0x40] sm:$0xff] %v493_v28 }
 0x199   :  { %v98_v33 = vmul.f32 %v1144_v13, %v96_v32  ;;  %v153_v13 = vpop.permute.xlu2 %152 }
 0x19a   :  { %v1150_v34 = vpop.eup %1149  ;;  %219 = vst [vmem:[#allocation5 + $0x40] sm:$0xff] %v153_v13 }
 0x19b   :  { %v91_v35 = vmul.f32 %v1150_v34, %v85_v25  ;;  %130 = vmatpush.msra.mxu1 %v98_v33  ;;  %144 = vst.msk [vmem:[%s1541_s3 + $0x8] sm:$0xff] %vm70_vm1, %v98_v33  ;;  %v447_v27 = vpop.f32.mrf.mxu3 }
 0x19c   :  { %919 = vst [vmem:[#allocation9 + $0x30] sm:$0xff] %v447_v27 }
 0x19d   :  { %v93_v37 = vsub.f32 2.0, %v91_v35 }
 0x19f   :  { %v95_v38 = vmul.f32 %v1150_v34, %v93_v37  ;;  %v496_v34 = vpop.f32.mrf.mxu0 }
 0x1a0   :  { %948 = vst [vmem:[#allocation9 + $0x118] sm:$0xff] %v496_v34 }
 0x1a1   :  { %v97_v39 = vmul.f32 %v1146_v16, %v95_v38  ;;  %v165_v21 = vpop.permute.xlu2 %164 }
 0x1a2   :  { %213 = vst [vmem:[#allocation5 + $0x10] sm:$0xff] %v165_v21 }
 0x1a3   :  { %131 = vmatpush.msra.mxu1 %v97_v39  ;;  %143 = vst.msk [vmem:[%s1541_s3] sm:$0xff] %vm70_vm1, %v97_v39 }
 0x1a4   :  { %1049 = vmatmul.msk.f32.vlgmr.msra.gmra.mxu1 %vm70_vm1, %v97_v39 }
 0x1a5   :  { %243 = vmatpush.msrb.mxu1 %v227_v18  ;;  %v335_v18 = vpop.f32.mrf.mxu2 }
 0x1a6   :  { %941 = vst [vmem:[#allocation9 + $0xe0] sm:$0xff] %v335_v18 }
 0x1a7   :  { %376 = vmatpush.msra.mxu1 %v268_v40  ;;  %v585_v39 = vpop.f32.mrf.mxu0 }
 0x1a8   :  { %925 = vst [vmem:[#allocation9 + $0x60] sm:$0xff] %v585_v39 }
 0x1a9   :  { %v169_v29 = vpop.permute.xlu2 %168 }
 0x1aa   :  { %221 = vst [vmem:[#allocation5 + $0x50] sm:$0xff] %v169_v29 }
 0x1ab   :  { %v161_v50 = vpop.permute.xlu1 %160 }
 0x1ac   :  { %1050 = vmatmul.msk.f32.gmra.mxu1 %vm70_vm1, %v98_v33  ;;  %v450_v33 = vpop.f32.mrf.mxu3  ;;  %220 = vst [vmem:[#allocation5 + $0x48] sm:$0xff] %v161_v50 }
 0x1ad   :  { %v424_v26 = vpop.f32.mrf.mxu2  ;;  %946 = vst [vmem:[#allocation9 + $0x108] sm:$0xff] %v450_v33 }
 0x1ae   :  { %918 = vst [vmem:[#allocation9 + $0x28] sm:$0xff] %v424_v26 }
 0x1af   :  { %v588_v44 = vpop.f32.mrf.mxu0 }
 0x1b0   :  { %952 = vst [vmem:[#allocation9 + $0x138] sm:$0xff] %v588_v44 }
 0x1b1   :  { %v173_v35 = vpop.permute.xlu2 %172 }
 0x1b2   :  { %214 = vst [vmem:[#allocation5 + $0x18] sm:$0xff] %v173_v35 }
 0x1b4   :  { %1051 = vmatmul.msk.f32.vlgmr.msrb.gmra.mxu1 %vm38_vm0, %v1352_v1  ;;  %v539_v38 = vpop.f32.mrf.mxu3  ;;  %v181_v55 = vpop.permute.xlu1 %180 }
 0x1b5   :  { %468 = vmatpush.msrb.mxu1 %v272_v45  ;;  %v427_v32 = vpop.f32.mrf.mxu2  ;;  %923 = vst [vmem:[#allocation9 + $0x50] sm:$0xff] %v539_v38 }
 0x1b6   :  { %945 = vst [vmem:[#allocation9 + $0x100] sm:$0xff] %v427_v32 }
 0x1b7   :  { %v677_v49 = vpop.f32.mrf.mxu0  ;;  %215 = vst [vmem:[#allocation5 + $0x20] sm:$0xff] %v181_v55 }
 0x1b8   :  { %929 = vst [vmem:[#allocation9 + $0x80] sm:$0xff] %v677_v49 }
 0x1b9   :  { %v177_v40 = vpop.permute.xlu2 %176 }
 0x1ba   :  { %222 = vst [vmem:[#allocation5 + $0x58] sm:$0xff] %v177_v40 }
 0x1bc   :  { %1059 = vmatmul.msk.f32.vlgmr.msra.gmra.mxu1 %vm38_vm0, %v1352_v1  ;;  %v542_v43 = vpop.f32.mrf.mxu3 }
 0x1bd   :  { %560 = vmatpush.msra.mxu1 %v276_v48  ;;  %v516_v37 = vpop.f32.mrf.mxu2  ;;  %950 = vst [vmem:[#allocation9 + $0x128] sm:$0xff] %v542_v43  ;;  %v189_v60 = vpop.permute.xlu1 %188 }
 0x1be   :  { %922 = vst [vmem:[#allocation9 + $0x48] sm:$0xff] %v516_v37 }
 0x1bf   :  { %v680_v54 = vpop.f32.mrf.mxu0  ;;  %216 = vst [vmem:[#allocation5 + $0x28] sm:$0xff] %v189_v60 }
 0x1c0   :  { %956 = vst [vmem:[#allocation9 + $0x158] sm:$0xff] %v680_v54 }
 0x1c1   :  { %v185_v45 = vpop.permute.xlu2 %184 }
 0x1c2   :  { %223 = vst [vmem:[#allocation5 + $0x60] sm:$0xff] %v185_v45 }
 0x1c4   :  { %1060 = vmatmul.msk.f32.gmra.mxu1 %vm38_vm0, %v1345_v0  ;;  %v631_v48 = vpop.f32.mrf.mxu3 }
 0x1c5   :  { %v519_v42 = vpop.f32.mrf.mxu2  ;;  %927 = vst [vmem:[#allocation9 + $0x70] sm:$0xff] %v631_v48 }
 0x1c6   :  { %949 = vst [vmem:[#allocation9 + $0x120] sm:$0xff] %v519_v42 }
 0x1c9   :  { %v197_v62 = vpop.permute.xlu2 %196 }
 0x1ca   :  { %217 = vst [vmem:[#allocation5 + $0x30] sm:$0xff] %v197_v62 }
 0x1cc   :  { %1067 = vmatmul.msk.f32.vlgmr.msrb.gmra.mxu1 %vm38_vm0, %v1352_v1 }
 0x1cd   :  { %652 = vmatpush.msrb.mxu1 %v280_v53  ;;  %v608_v47 = vpop.f32.mrf.mxu2  ;;  %v634_v53 = vpop.f32.mrf.mxu3 }
 0x1ce   :  { %926 = vst [vmem:[#allocation9 + $0x68] sm:$0xff] %v608_v47 }
 0x1cf   :  { %954 = vst [vmem:[#allocation9 + $0x148] sm:$0xff] %v634_v53 }
 0x1d1   :  { %v205_v5 = vpop.permute.xlu2 %204 }
 0x1d2   :  { %218 = vst [vmem:[#allocation5 + $0x38] sm:$0xff] %v205_v5 }
 0x1d4   :  { %1068 = vmatmul.msk.f32.gmra.mxu1 %vm38_vm0, %v1345_v0 }
 0x1d5   :  { %v611_v52 = vpop.f32.mrf.mxu2  ;;  %v723_v58 = vpop.f32.mrf.mxu3 }
 0x1d6   :  { %953 = vst [vmem:[#allocation9 + $0x140] sm:$0xff] %v611_v52 }
 0x1d7   :  { %931 = vst [vmem:[#allocation9 + $0x90] sm:$0xff] %v723_v58 }
 0x1d9   :  { %v259_v10 = vpop.permute.xlu2 %258 }
 0x1da   :  { %264 = vst.msk [vmem:[#allocation8 + $0x8] sm:$0xff] %vm262_vm5, %v259_v10 }
 0x1dc   :  { %1075 = vmatmul.msk.f32.vlgmr.msra.gmra.mxu1 %vm38_vm0, %v1352_v1 }
 0x1dd   :  { %744 = vmatpush.msra.mxu1 %v284_v59  ;;  %v700_v57 = vpop.f32.mrf.mxu2  ;;  %v769_v59 = vpop.f32.mrf.mxu0 }
 0x1de   :  { %930 = vst [vmem:[#allocation9 + $0x88] sm:$0xff] %v700_v57  ;;  %v726_v3 = vpop.f32.mrf.mxu3 }
 0x1df   :  { %933 = vst [vmem:[#allocation9 + $0xa0] sm:$0xff] %v769_v59 }
 0x1e0   :  { %958 = vst [vmem:[#allocation9 + $0x168] sm:$0xff] %v726_v3 }
 0x1e4   :  { %1076 = vmatmul.msk.f32.gmra.mxu1 %vm38_vm0, %v1345_v0 }
 0x1e5   :  { %v703_v2 = vpop.f32.mrf.mxu2  ;;  %v772_v4 = vpop.f32.mrf.mxu0 }
 0x1e6   :  { %957 = vst [vmem:[#allocation9 + $0x160] sm:$0xff] %v703_v2 }
 0x1e7   :  { %960 = vst [vmem:[#allocation9 + $0x178] sm:$0xff] %v772_v4 }
 0x1ec   :  { %1083 = vmatmul.msk.f32.vlgmr.msrb.gmra.mxu1 %vm38_vm0, %v1352_v1 }
 0x1ed   :  { %836 = vmatpush.msrb.mxu1 %v288_v63  ;;  %v792_v7 = vpop.f32.mrf.mxu2 }
 0x1ee   :  { %934 = vst [vmem:[#allocation9 + $0xa8] sm:$0xff] %v792_v7 }
 0x1f4   :  { %1084 = vmatmul.msk.f32.gmra.mxu1 %vm38_vm0, %v1345_v0 }
 0x1f5   :  { %v795_v12 = vpop.f32.mrf.mxu2 }
 0x1f6   :  { %961 = vst [vmem:[#allocation9 + $0x180] sm:$0xff] %v795_v12 }
 0x1fc   :  { %1091 = vmatmul.msk.f32.vlgmr.msra.gmra.mxu1 %vm38_vm0, %v1352_v1 }
 0x204   :  { %1092 = vmatmul.msk.f32.gmra.mxu1 %vm38_vm0, %v1345_v0 }
 0x20c   :  { %1099 = vmatmul.msk.f32.vlgmr.msrb.gmra.mxu1 %vm38_vm0, %v1352_v1  ;;  %v99_v1 = vlaneseq }
 0x20e   :  { %v100_v8 = vshrl.u32 %v99_v1, 7  ;;  %v103_v9 = vand.u32 127, %v99_v1  ;;  %v815_v1 = vpop.f32.mrf.mxu3 }
 0x20f   :  { %935 = vst [vmem:[#allocation9 + $0xb0] sm:$0xff] %v815_v1 }
 0x210   :  { %vm104_vm3 = vcmp.eq.s32.totalorder %v100_v8, %v103_v9  ;;  %v101_v17 = vadd.s32 8, %v100_v8  ;;  %v861_v8 = vpop.f32.mrf.mxu0 }
 0x211   :  { %937 = vst [vmem:[#allocation9 + $0xc0] sm:$0xff] %v861_v8 }
 0x212   :  { %vm105_vm4 = vcmp.eq.s32.totalorder %v101_v17, %v103_v9  ;;  %v193_v9 = vpop.permute.xlu0 %192 }
 0x213   :  { %v1048_v23 = vsel %vm105_vm4, 1.0, %v1289_v14  ;;  %224 = vst [vmem:[#allocation5 + $0x68] sm:$0xff] %v193_v9 }
 0x214   :  { %1100 = vmatmul.msk.f32.gmra.mxu1 %vm38_vm0, %v1345_v0  ;;  %v1047_v0 = vsel %vm104_vm3, 1.0, %v1289_v14 }
 0x216   :  { %v818_v13 = vpop.f32.mrf.mxu3 }
 0x217   :  { %962 = vst [vmem:[#allocation9 + $0x188] sm:$0xff] %v818_v13 }
 0x218   :  { %v864_v14 = vpop.f32.mrf.mxu0 }
 0x219   :  { %964 = vst [vmem:[#allocation9 + $0x198] sm:$0xff] %v864_v14 }
 0x21e   :  { %v907_v17 = vpop.f32.mrf.mxu3 }
 0x21f   :  { %939 = vst [vmem:[#allocation9 + $0xd0] sm:$0xff] %v907_v17 }
 0x221   :  { %v133_v15 = vpop.f32.mrf.mxu1 }
 0x222   :  { %v139_v16 = vmul.f32 2.0, %v133_v15 }
 0x224   :  { %v141_v22 = vsub.f32 %v139_v16, %v1047_v0  ;;  %v201_v0 = vpop.permute.xlu1 %200  ;;  %v884_v16 = vpop.f32.mrf.mxu2 }
 0x225   :  { %225 = vst [vmem:[#allocation5 + $0x70] sm:$0xff] %v201_v0 }
 0x226   :  { %145 = vst.msk [vmem:[%s1541_s3 + $0x10] sm:$0xff] %vm70_vm1, %v141_v22  ;;  %v910_v21 = vpop.f32.mrf.mxu3 }
 0x227   :  { %938 = vst [vmem:[#allocation9 + $0xc8] sm:$0xff] %v884_v16 }
 0x228   :  { %966 = vst [vmem:[#allocation9 + $0x1a8] sm:$0xff] %v910_v21 }
 0x229   :  { %v136_v24 = vpop.f32.mrf.mxu1 }
 0x22a   :  { %v140_v25 = vmul.f32 2.0, %v136_v24 }
 0x22c   :  { %v142_v30 = vsub.f32 %v140_v25, %v1048_v23  ;;  %v209_v18 = vpop.permute.xlu1 %208  ;;  %v887_v20 = vpop.f32.mrf.mxu2 }
 0x22d   :  { %226 = vst [vmem:[#allocation5 + $0x78] sm:$0xff] %v209_v18 }
 0x22e   :  { %146 = vst.msk [vmem:[%s1541_s3 + $0x18] sm:$0xff] %vm70_vm1, %v142_v30 }
 0x22f   :  { %981 = dma.vmem_to_hbm [thread:$0]  %s974_s27, 2048, %s976_s25, [#allocation4], %s1294_s28, %s1294_s28, %s1288_s13   ;;  %965 = vst [vmem:[#allocation9 + $0x1a0] sm:$0xff] %v887_v20 }
 0x231   :  { %v245_v31 = vpop.f32.mrf.mxu1 }
 0x232   :  { %252 = vst.msk [vmem:[#allocation6] sm:$0xff] %vm251_vm2, %v245_v31  ;;  %256 = vrot.lane.b32.xlu0 %v245_v31, %s1288_s13  ;;  %s1001_s13 = sshll.u32 %s1544_s6, 4  ;;  %s1002_s13 = int_to_ptr.hbm [resolvable:$true] %s1001_s13 }
 0x233   :  { %994 = dma.vmem_to_hbm [thread:$0]  %s987_s17, 256, %s989_s20, [#allocation7], %s1291_s5, %s1291_s5, %s1292_s23  }
 0x239   :  { %v378_v36 = vpop.f32.mrf.mxu1 }
 0x23a   :  { %916 = vst [vmem:[#allocation9 + $0x18] sm:$0xff] %v378_v36 }
 0x241   :  { %v381_v41 = vpop.f32.mrf.mxu1 }
 0x242   :  { %943 = vst [vmem:[#allocation9 + $0xf0] sm:$0xff] %v381_v41 }
 0x249   :  { %v470_v46 = vpop.f32.mrf.mxu1 }
 0x24a   :  { %920 = vst [vmem:[#allocation9 + $0x38] sm:$0xff] %v470_v46 }
 0x251   :  { %v473_v51 = vpop.f32.mrf.mxu1 }
 0x252   :  { %947 = vst [vmem:[#allocation9 + $0x110] sm:$0xff] %v473_v51 }
 0x259   :  { %v562_v56 = vpop.f32.mrf.mxu1 }
 0x25a   :  { %924 = vst [vmem:[#allocation9 + $0x58] sm:$0xff] %v562_v56 }
 0x261   :  { %v565_v63 = vpop.f32.mrf.mxu1 }
 0x262   :  { %951 = vst [vmem:[#allocation9 + $0x130] sm:$0xff] %v565_v63 }
 0x269   :  { %v654_v6 = vpop.f32.mrf.mxu1 }
 0x26a   :  { %928 = vst [vmem:[#allocation9 + $0x78] sm:$0xff] %v654_v6 }
 0x271   :  { %v657_v11 = vpop.f32.mrf.mxu1 }
 0x272   :  { %955 = vst [vmem:[#allocation9 + $0x150] sm:$0xff] %v657_v11 }
 0x279   :  { %v746_v15 = vpop.f32.mrf.mxu1 }
 0x27a   :  { %932 = vst [vmem:[#allocation9 + $0x98] sm:$0xff] %v746_v15 }
 0x281   :  { %v749_v19 = vpop.f32.mrf.mxu1 }
 0x282   :  { %959 = vst [vmem:[#allocation9 + $0x170] sm:$0xff] %v749_v19 }
 0x289   :  { %v838_v22 = vpop.f32.mrf.mxu1 }
 0x28a   :  { %936 = vst [vmem:[#allocation9 + $0xb8] sm:$0xff] %v838_v22 }
 0x291   :  { %v841_v23 = vpop.f32.mrf.mxu1 }
 0x292   :  { %963 = vst [vmem:[#allocation9 + $0x190] sm:$0xff] %v841_v23 }
 0x293   :  { %1020 = dma.vmem_to_hbm [thread:$0]  %s1013_s4, 6912, %s1015_s9, [#allocation10], %s1296_s0, %s1296_s0, %s1297_s2  }
 0x2a4   :  { %v257_v24 = vpop.permute.xlu0 %256 }
 0x2a5   :  { %263 = vst.msk [vmem:[#allocation8] sm:$0xff] %vm262_vm5, %v257_v24 }
 0x2a6   :  { %1007 = dma.vmem_to_hbm [thread:$0]  %s1000_s10, 256, %s1002_s13, [#allocation7], %s1291_s5, %s1291_s5, %s1292_s23  }
 0x2a7   :  { %1273 = dma.done.wait [#allocation4], 2048  }
 0x2a8   :  { %1274 = vsyncadd [#allocation4], 4294965248 }
 0x2a9   :  { %1275 = dma.done.wait [#allocation7], 512  }
 0x2aa   :  { %1276 = vsyncadd [#allocation7], 4294966784 }
 0x2ab   :  { %1277 = dma.done.wait [#allocation10], 6912  }
 0x2ac   :  { %1278 = vsyncadd [#allocation10], 4294960384 }
 0x2ad   :  { %1039 = vsyncpa [#allocation3], 1 }
 0x2ae   :  { %1040 = vsyncpa [#allocation4], 1 }
 0x2af   :  { %1041 = vsyncpa [#allocation7], 1 }
 0x2b0   :  { %1042 = vsyncpa [#allocation10], 1 }

</bundles_post_ra>
